<compile_context>
chip_gen: v5e
topology: v5e:2x2
jax: 0.10.0
libtpu: 0.0.40
codegen_flags: <defaults>
</compile_context>

<pallas_src>
import jax
import jax.numpy as jnp
from jax.experimental import pallas as pl
from jax.experimental.pallas import tpu as pltpu


def _identity_kernel(x_ref, o_ref):
    # LinearActivation.forward(x) == x  -> pure elementwise copy (VPU/vst path).
    o_ref[...] = x_ref[...]


def linear_activation(x: jax.Array) -> jax.Array:
    """Pallas implementation of LinearActivation (identity)."""
    orig_shape = x.shape
    dtype = x.dtype
    total = x.size

    if total == 0:
        return x

    itemsize = jnp.dtype(dtype).itemsize
    total_bytes = total * itemsize

    # Lane-dense factorization: widest lane (multiple of 128) that divides total.
    lane = None
    for cand in (1024, 512, 256, 128):
        if total % cand == 0:
            lane = cand
            break
    if lane is None:
        # Odd total: single full-array block (block_shape == array dims is legal).
        lane = total
    rows = total // lane
    x2d = x.reshape(rows, lane)

    # Sublane packing multiple: 8 for f32, 16 for bf16, 32 for int8.
    sub = max(1, 32 // itemsize)

    # ~2 MiB blocks: 2 buffers x (in + out) = ~8 MiB, fits v5e's 16 MiB scoped
    # VMEM default and leaves huge headroom on v6e (128 MiB) / v7x (64 MiB).
    target_block_bytes = 2 * 1024 * 1024
    tile_r = (target_block_bytes // (lane * itemsize)) // sub * sub
    tile_r = max(sub, tile_r)

    if lane == total or total_bytes < (1 << 20) or rows <= tile_r:
        # Fast path for tiny / oddly-sized inputs: one full-array block
        # (avoids ~0.35 us per-grid-step overhead on toy shapes).
        tile_r = rows
        grid = (1,)
    else:
        grid = (pl.cdiv(rows, tile_r),)

    out2d = pl.pallas_call(
        _identity_kernel,
        out_shape=jax.ShapeDtypeStruct((rows, lane), dtype),
        grid_spec=pltpu.PrefetchScalarGridSpec(
            num_scalar_prefetch=0,
            grid=grid,
            in_specs=[pl.BlockSpec((tile_r, lane), lambda i: (i, 0))],
            out_specs=pl.BlockSpec((tile_r, lane), lambda i: (i, 0)),
        ),
        compiler_params=pltpu.CompilerParams(
            # Independent blocks -> shard grid across both TensorCores on v7x;
            # a no-op on single-TC v5e/v6e.
            dimension_semantics=("parallel",),
        ),
        cost_estimate=pl.CostEstimate(
            flops=0,
            transcendentals=0,
            bytes_accessed=2 * total_bytes,
        ),
        # Identity: let XLA reuse the input buffer for the output when it can
        # (may-alias semantics; falls back to a copy if the input stays live).
        input_output_aliases={0: 0},
    )(x2d)

    return out2d.reshape(orig_shape)


if __name__ == "__main__":
    key = jax.random.PRNGKey(0)
    # Small NCHW input consistent with a conv-style module: batch=2, C=4, H=W=16.
    x = jax.random.normal(key, (2, 4, 16, 16), dtype=jnp.float32)

    y = linear_activation(x)
    jax.block_until_ready(y)

    assert y.shape == x.shape and y.dtype == x.dtype
    assert jnp.array_equal(y, x)

    # Also exercise the tiled (multi-block) path on a larger, pipelined shape.
    x_big = jax.random.normal(key, (8, 64, 64, 64), dtype=jnp.float32)  # 8 MiB
    y_big = linear_activation(x_big)
    jax.block_until_ready(y_big)
    assert jnp.array_equal(y_big, x_big)

    print("KERNEL_OK")
</pallas_src>

<mosaic_0001>
module attributes {stable_mosaic.version = 11 : i64} {
  func.func @_identity_kernel(%arg0: i32, %arg1: memref<2x1024xf32, #tpu.memory_space<vmem>>, %arg2: memref<2x1024xf32, #tpu.memory_space<vmem>>) attributes {dimension_semantics = [#tpu.dimension_semantics<parallel>], iteration_bounds = array<i64: 1>, scalar_prefetch = 0 : i64, scratch_operands = 0 : i64, tpu.core_type = #tpu.core_type<tc>, window_params = [{transform_indices = @transform_0, window_bounds = array<i64: 2, 1024>}, {transform_indices = @transform_1, window_bounds = array<i64: 2, 1024>}]} {
    %c0 = arith.constant 0 : index
    %c0_0 = arith.constant 0 : index
    %0 = vector.load %arg1[%c0, %c0_0] : memref<2x1024xf32, #tpu.memory_space<vmem>>, vector<2x1024xf32>
    %c0_1 = arith.constant 0 : index
    %c0_2 = arith.constant 0 : index
    %1 = vector.load %arg2[%c0_1, %c0_2] : memref<2x1024xf32, #tpu.memory_space<vmem>>, vector<2x1024xf32>
    tpu.vector_store %arg2[%c0_1, %c0_2], %0 {strides = array<i32>} : memref<2x1024xf32, #tpu.memory_space<vmem>>, vector<2x1024xf32>,
    return
  }
  func.func @transform_0(%arg0: i32) -> (i32, i32) {
    %c0_i32 = arith.constant 0 : i32
    %c0_i32_0 = arith.constant 0 : i32
    return %arg0, %c0_i32 : i32, i32
  }
  func.func @transform_1(%arg0: i32) -> (i32, i32) {
    %c0_i32 = arith.constant 0 : i32
    %c0_i32_0 = arith.constant 0 : i32
    return %arg0, %c0_i32 : i32, i32
  }
}

</mosaic_0001>

<bundles_post_ra>
// kernel: tpu_custom_call.1
= control target key start
LH: loop header
LB: loop body
LE: loop exit
PB: predicated region body
PF: predicated region fallthrough
CT: control target
= control target key end

     0   :  { %6 = vsyncpa [#allocation3], 0  ;;  %s116_s0 = inlined_call_operand.hbm [shape: f32[2,1024], index: 0, kind: input, shape index: {}, may-alias: {0,1}]   ;;  %s117_s1 = inlined_call_operand.hbm [shape: f32[2,1024], index: 1, kind: output, shape index: {}, may-alias: {0,1}]  }
   0x1   :  { %7 = vsyncpa [#allocation4], 0  ;;  %s13_s8 = sshll.u32 %s116_s0, 4  ;;  %s98_s9 = smov [#allocation2]   ;;  %s14_s8 = int_to_ptr.hbm [resolvable:$true] %s13_s8 }
   0x2   :  { %s15_s10 = sshll.u32 %s98_s9, 4  ;;  %s16_s10 = int_to_ptr.vmem [resolvable:$true] %s15_s10 }
   0x3   :  { %18 = dma.hbm_to_vmem [thread:$0]  %s14_s8, 256, %s16_s10, [#allocation3]  }
   0x4   :  { %94 = dma.done.wait [#allocation3], 256  }
   0x5   :  { %95 = vsyncadd [#allocation3], 4294967040  ;;  %s99_s11 = smov [#allocation5]   ;;  %s34_s15 = sshll.u32 %s117_s1, 4  ;;  %v23_v0 = vld [vmem:[#allocation2] sm:$0xff]  ;;  %v24_v1 = vld [vmem:[#allocation2 + $0x8] sm:$0xff]  ;;  %s35_s15 = int_to_ptr.hbm [resolvable:$true] %s34_s15 }
   0x6   :  { %s32_s12 = sshll.u32 %s99_s11, 4  ;;  %25 = vst [vmem:[#allocation5] sm:$0xff] %v23_v0  ;;  %s33_s12 = int_to_ptr.vmem [resolvable:$true] %s32_s12 }
   0x7   :  { %26 = vst [vmem:[#allocation5 + $0x8] sm:$0xff] %v24_v1 }
   0x8   :  { %37 = dma.vmem_to_hbm [thread:$0]  %s33_s12, 256, %s35_s15, [#allocation4]  }
   0x9   :  { %96 = dma.done.wait [#allocation4], 256  }
   0xa   :  { %97 = vsyncadd [#allocation4], 4294967040 }
   0xb   :  { %42 = vsyncpa [#allocation3], 1 }
   0xc   :  { %43 = vsyncpa [#allocation4], 1 }

</bundles_post_ra>
